<compile_context>
chip_gen: v7x
topology: tpu7x:2x2x1
jax: 0.10.0
libtpu: 0.0.40
codegen_flags: <defaults>
</compile_context>

<pallas_src>
import jax
import jax.numpy as jnp
from jax.experimental import pallas as pl
from jax.experimental.pallas import tpu as pltpu


def _hier_gcn_kernel(h_ref, adj_ref, eb_ref, gw_ref, gb_ref, o_ref):
    """One batch tile: h_ref is a lane-folded (Np, Bt*D) slab.

    adj_ref : (2*Np, Np)      stacked [adj_in ; adj_out]
    eb_ref  : (2*Np, Bt*D)    stacked, batch-tiled [edge_bias ; out_edge_bias]
    gw_ref  : (Bt*D, 3*Bt*D)  fused gate projection (already broadcast over lanes)
    gb_ref  : (Np, 3*Bt*D)    fused gate biases [in | out | zeros]
    o_ref   : (Np, Bt*D)
    """
    h = h_ref[...]                                           # (Np, BtD) f32
    np_, btd = h.shape

    # One MXU matmul for both message directions.
    msgs = jnp.dot(adj_ref[...], h, preferred_element_type=jnp.float32)
    msgs = msgs + eb_ref[...]                                # (2*Np, BtD)

    # One MXU matmul for all three gates, result already expanded over lanes.
    gates = jax.nn.sigmoid(
        jnp.dot(h, gw_ref[...], preferred_element_type=jnp.float32) + gb_ref[...]
    )                                                        # (Np, 3*BtD)

    msg = (
        msgs[:np_] * gates[:, :btd]          # bottom-up (child -> parent) message
        + msgs[np_:] * gates[:, btd:2 * btd] # top-down (parent -> child) message
        + h * gates[:, 2 * btd:]             # self-loop message
    )
    o_ref[...] = jnp.maximum(msg, 0.0).astype(o_ref.dtype)


def _pick_bt(B, D):
    """Smallest batch tile Bt that divides B with Bt*D a multiple of 128 (lane-dense
    stores, >=2 grid steps when the batch allows); fall back to the whole batch."""
    for bt in range(1, B + 1):
        if B % bt == 0 and (bt * D) % 128 == 0 and bt * D <= 4096:
            return bt
    return B


def hierarchy_gcn_forward(inputs, params):
    """inputs: (B, N, D) float32 ; params: dict matching HierarchyGCNModule."""
    B, N, D = inputs.shape
    f32 = jnp.float32

    Bt = _pick_bt(B, D)
    steps = B // Bt
    BtD = Bt * D
    Np = ((N + 7) // 8) * 8          # pad nodes to a sublane multiple
    pad_n = Np - N

    # ---- lane-folded activation slab: (Np, B*D), slab[n, b*D+d] = inputs[b, n, d] ----
    x = jnp.transpose(inputs.astype(f32), (1, 0, 2)).reshape(N, B * D)
    if pad_n:
        x = jnp.pad(x, ((0, pad_n), (0, 0)))

    # ---- batch-invariant preprocessing (hoisted out of the kernel) ----
    origin_adj = params["origin_adj"].astype(f32)
    adj_in = origin_adj * params["adj_matrix"].astype(f32)
    adj_out = origin_adj.T * params["out_adj_matrix"].astype(f32)
    adj_in = jnp.pad(adj_in, ((0, pad_n), (0, pad_n)))
    adj_out = jnp.pad(adj_out, ((0, pad_n), (0, pad_n)))
    adj_stacked = jnp.concatenate([adj_in, adj_out], axis=0)            # (2Np, Np)

    # Edge biases, tiled over the Bt lane-folded batches and stacked [in ; out].
    eb_in = jnp.tile(params["edge_bias"].astype(f32), (1, Bt))          # (N, BtD)
    eb_out = jnp.tile(params["out_edge_bias"].astype(f32), (1, Bt))
    eb_in = jnp.pad(eb_in, ((0, pad_n), (0, 0)))
    eb_out = jnp.pad(eb_out, ((0, pad_n), (0, 0)))
    eb_stacked = jnp.concatenate([eb_in, eb_out], axis=0)               # (2Np, BtD)

    # Fused gate projection matrix M: (BtD, 3*BtD) with
    #   M[b*D+k, g*BtD + c*D + d] = W_gates[k, g] * (b == c)
    # so (h_slab @ M)[n, g*BtD + c*D + d] = gate_g(batch c, node n), pre-broadcast over d.
    W_gates = jnp.concatenate(
        [params["gate_weight"], params["out_gate_weight"], params["loop_gate"]],
        axis=1,
    ).astype(f32)                                                       # (D, 3)
    eyeB = jnp.eye(Bt, dtype=f32)
    M5 = jnp.einsum("kg,bc->gbkc", W_gates, eyeB)                       # (3, Bt, D, Bt)
    M5 = jnp.broadcast_to(M5[..., None], (3, Bt, D, Bt, D))
    gate_w = jnp.transpose(M5, (1, 2, 0, 3, 4)).reshape(BtD, 3 * BtD)

    # Fused gate biases: [bias_gate | out_bias_gate | 0], each tiled to (N, BtD).
    gate_bias = jnp.concatenate(
        [
            jnp.tile(params["bias_gate"].astype(f32), (1, BtD)),
            jnp.tile(params["out_bias_gate"].astype(f32), (1, BtD)),
            jnp.zeros((N, BtD), f32),
        ],
        axis=1,
    )                                                                   # (N, 3*BtD)
    gate_bias = jnp.pad(gate_bias, ((0, pad_n), (0, 0)))

    kernel = pl.pallas_call(
        _hier_gcn_kernel,
        out_shape=jax.ShapeDtypeStruct((Np, B * D), inputs.dtype),
        grid=(steps,),
        in_specs=[
            pl.BlockSpec((Np, BtD), lambda i: (0, i)),           # h slab (batch-tiled on lanes)
            pl.BlockSpec((2 * Np, Np), lambda i: (0, 0)),        # stacked adjacency
            pl.BlockSpec((2 * Np, BtD), lambda i: (0, 0)),       # stacked edge bias
            pl.BlockSpec((BtD, 3 * BtD), lambda i: (0, 0)),      # fused gate projection
            pl.BlockSpec((Np, 3 * BtD), lambda i: (0, 0)),       # fused gate bias
        ],
        out_specs=pl.BlockSpec((Np, BtD), lambda i: (0, i)),
        compiler_params=pltpu.CompilerParams(
            dimension_semantics=("parallel",),
        ),
    )

    out_fold = kernel(x, adj_stacked, eb_stacked, gate_w, gate_bias)    # (Np, B*D)
    return out_fold[:N].reshape(N, B, D).transpose(1, 0, 2)             # (B, N, D)


def _reference_forward(inputs, params):
    """Pure-JAX reference mirroring the PyTorch module (dropout = identity)."""
    h = inputs
    adj_in = params["origin_adj"] * params["adj_matrix"]
    adj_out = params["origin_adj"].T * params["out_adj_matrix"]

    h_in = jnp.einsum("nm,bmd->bnd", adj_in, h)
    in_gate = jnp.einsum("bnd,do->bno", h, params["gate_weight"]) + params["bias_gate"]
    in_msg = (h_in + params["edge_bias"]) * jax.nn.sigmoid(in_gate)

    h_out = jnp.einsum("nm,bmd->bnd", adj_out, h)
    out_gate = jnp.einsum("bnd,do->bno", h, params["out_gate_weight"]) + params["out_bias_gate"]
    out_msg = (h_out + params["out_edge_bias"]) * jax.nn.sigmoid(out_gate)

    loop_gate = jnp.einsum("bnd,do->bno", h, params["loop_gate"])
    loop_msg = h * jax.nn.sigmoid(loop_gate)

    return jax.nn.relu(in_msg + out_msg + loop_msg)


def _xavier_uniform(key, shape):
    fan_in, fan_out = shape[0], shape[1]
    bound = (6.0 / (fan_in + fan_out)) ** 0.5
    return jax.random.uniform(key, shape, jnp.float32, minval=-bound, maxval=bound)


def make_params(key, num_nodes, in_dim):
    """Deterministic synthetic parameters matching HierarchyGCNModule.__init__."""
    k_adj, k_gw, k_ogw, k_lg = jax.random.split(key, 4)

    # Synthetic hierarchy adjacency: child->parent probabilities (sparse-ish).
    raw = jax.random.uniform(k_adj, (num_nodes, num_nodes), jnp.float32)
    in_adj = jnp.where(raw > 0.7, raw, 0.0)
    out_adj = in_adj.T                       # parent->child matrix, as in HiAGM usage
    origin_adj = jnp.where(in_adj <= 0, in_adj, 1.0)

    return {
        "adj_matrix": in_adj,
        "out_adj_matrix": out_adj,
        "origin_adj": origin_adj,
        "edge_bias": jnp.zeros((num_nodes, in_dim), jnp.float32),
        "gate_weight": _xavier_uniform(k_gw, (in_dim, 1)),
        "bias_gate": jnp.zeros((num_nodes, 1), jnp.float32),
        "out_edge_bias": jnp.zeros((num_nodes, in_dim), jnp.float32),
        "out_gate_weight": _xavier_uniform(k_ogw, (in_dim, 1)),
        # out_bias_gate is left uninitialized in the PyTorch module's reset_parameters;
        # we choose zeros deterministically here.
        "out_bias_gate": jnp.zeros((num_nodes, 1), jnp.float32),
        "loop_gate": _xavier_uniform(k_lg, (in_dim, 1)),
    }


if __name__ == "__main__":
    B, N, D = 8, 16, 32  # batch, num hierarchy nodes, node feature dim
    # -> Bt = 4, grid = (2,), lane-folded slabs of (16, 128)

    key = jax.random.PRNGKey(0)
    k_x, k_p = jax.random.split(key)
    x = jax.random.normal(k_x, (B, N, D), jnp.float32)
    params = make_params(k_p, N, D)

    out = hierarchy_gcn_forward(x, params)
    out = jax.block_until_ready(out)

    ref = _reference_forward(x, params)
    assert out.shape == (B, N, D)
    assert jnp.allclose(out, ref, atol=1e-5, rtol=1e-5), "Pallas output mismatch vs reference"

    print("KERNEL_OK")
</pallas_src>

<mosaic_0001>
module attributes {stable_mosaic.version = 11 : i64} {
  func.func @_hier_gcn_kernel(%arg0: i32, %arg1: memref<16x128xf32, #tpu.memory_space<vmem>>, %arg2: memref<32x16xf32, #tpu.memory_space<vmem>>, %arg3: memref<32x128xf32, #tpu.memory_space<vmem>>, %arg4: memref<128x384xf32, #tpu.memory_space<vmem>>, %arg5: memref<16x384xf32, #tpu.memory_space<vmem>>, %arg6: memref<16x128xf32, #tpu.memory_space<vmem>>) attributes {dimension_semantics = [#tpu.dimension_semantics<parallel>], iteration_bounds = array<i64: 2>, scalar_prefetch = 0 : i64, scratch_operands = 0 : i64, tpu.core_type = #tpu.core_type<tc>, window_params = [{transform_indices = @transform_0, window_bounds = array<i64: 16, 128>}, {pipeline_mode = #tpu.pipeline_mode<synchronous>, transform_indices = @transform_1, window_bounds = array<i64: 32, 16>}, {pipeline_mode = #tpu.pipeline_mode<synchronous>, transform_indices = @transform_2, window_bounds = array<i64: 32, 128>}, {pipeline_mode = #tpu.pipeline_mode<synchronous>, transform_indices = @transform_3, window_bounds = array<i64: 128, 384>}, {pipeline_mode = #tpu.pipeline_mode<synchronous>, transform_indices = @transform_4, window_bounds = array<i64: 16, 384>}, {transform_indices = @transform_5, window_bounds = array<i64: 16, 128>}]} {
    %c0 = arith.constant 0 : index
    %c0_0 = arith.constant 0 : index
    %0 = vector.load %arg1[%c0, %c0_0] : memref<16x128xf32, #tpu.memory_space<vmem>>, vector<16x128xf32>
    %c0_1 = arith.constant 0 : index
    %c0_2 = arith.constant 0 : index
    %1 = vector.load %arg2[%c0_1, %c0_2] : memref<32x16xf32, #tpu.memory_space<vmem>>, vector<32x16xf32>
    %cst = arith.constant dense<0.000000e+00> : vector<32x128xf32>
    %2 = tpu.matmul %1, %0, %cst {dimension_numbers = #tpu.dot_dimension_numbers<[1], [0], [0], [1], [0, 0, 1, 1], [], []>} : vector<32x16xf32>, vector<16x128xf32>, vector<32x128xf32> -> vector<32x128xf32>
    %c0_3 = arith.constant 0 : index
    %c0_4 = arith.constant 0 : index
    %3 = vector.load %arg3[%c0_3, %c0_4] : memref<32x128xf32, #tpu.memory_space<vmem>>, vector<32x128xf32>
    %4 = arith.addf %2, %3 : vector<32x128xf32>
    %c0_5 = arith.constant 0 : index
    %c0_6 = arith.constant 0 : index
    %5 = vector.load %arg4[%c0_5, %c0_6] : memref<128x384xf32, #tpu.memory_space<vmem>>, vector<128x384xf32>
    %cst_7 = arith.constant dense<0.000000e+00> : vector<16x384xf32>
    %6 = tpu.matmul %0, %5, %cst_7 {dimension_numbers = #tpu.dot_dimension_numbers<[1], [0], [0], [1], [0, 0, 1, 1], [], []>} : vector<16x128xf32>, vector<128x384xf32>, vector<16x384xf32> -> vector<16x384xf32>
    %c0_8 = arith.constant 0 : index
    %c0_9 = arith.constant 0 : index
    %7 = vector.load %arg5[%c0_8, %c0_9] : memref<16x384xf32, #tpu.memory_space<vmem>>, vector<16x384xf32>
    %8 = arith.addf %6, %7 : vector<16x384xf32>
    %9 = arith.negf %8 : vector<16x384xf32>
    %10 = math.exp %9 : vector<16x384xf32>
    %cst_10 = arith.constant 1.000000e+00 : f32
    %11 = vector.broadcast %cst_10 : f32 to vector<16x384xf32>
    %12 = arith.addf %11, %10 : vector<16x384xf32>
    %13 = arith.divf %11, %12 : vector<16x384xf32>
    %14 = vector.extract_strided_slice %4 {offsets = [0, 0], sizes = [16, 128], strides = [1, 1]} : vector<32x128xf32> to vector<16x128xf32>
    %15 = vector.extract_strided_slice %13 {offsets = [0, 0], sizes = [16, 128], strides = [1, 1]} : vector<16x384xf32> to vector<16x128xf32>
    %16 = arith.mulf %14, %15 : vector<16x128xf32>
    %17 = vector.extract_strided_slice %4 {offsets = [16, 0], sizes = [16, 128], strides = [1, 1]} : vector<32x128xf32> to vector<16x128xf32>
    %18 = vector.extract_strided_slice %13 {offsets = [0, 128], sizes = [16, 128], strides = [1, 1]} : vector<16x384xf32> to vector<16x128xf32>
    %19 = arith.mulf %17, %18 : vector<16x128xf32>
    %20 = arith.addf %16, %19 : vector<16x128xf32>
    %21 = vector.extract_strided_slice %13 {offsets = [0, 256], sizes = [16, 128], strides = [1, 1]} : vector<16x384xf32> to vector<16x128xf32>
    %22 = arith.mulf %0, %21 : vector<16x128xf32>
    %23 = arith.addf %20, %22 : vector<16x128xf32>
    %cst_11 = arith.constant 0.000000e+00 : f32
    %24 = vector.broadcast %cst_11 : f32 to vector<16x128xf32>
    %25 = arith.maximumf %23, %24 : vector<16x128xf32>
    %c0_12 = arith.constant 0 : index
    %c0_13 = arith.constant 0 : index
    %26 = vector.load %arg6[%c0_12, %c0_13] : memref<16x128xf32, #tpu.memory_space<vmem>>, vector<16x128xf32>
    tpu.vector_store %arg6[%c0_12, %c0_13], %25 {strides = array<i32>} : memref<16x128xf32, #tpu.memory_space<vmem>>, vector<16x128xf32>,
    return
  }
  func.func @transform_0(%arg0: i32) -> (i32, i32) {
    %c0_i32 = arith.constant 0 : i32
    %c0_i32_0 = arith.constant 0 : i32
    return %c0_i32, %arg0 : i32, i32
  }
  func.func @transform_1(%arg0: i32) -> (i32, i32) {
    %c0_i32 = arith.constant 0 : i32
    %c0_i32_0 = arith.constant 0 : i32
    %c0_i32_1 = arith.constant 0 : i32
    return %c0_i32, %c0_i32_0 : i32, i32
  }
  func.func @transform_2(%arg0: i32) -> (i32, i32) {
    %c0_i32 = arith.constant 0 : i32
    %c0_i32_0 = arith.constant 0 : i32
    %c0_i32_1 = arith.constant 0 : i32
    return %c0_i32, %c0_i32_0 : i32, i32
  }
  func.func @transform_3(%arg0: i32) -> (i32, i32) {
    %c0_i32 = arith.constant 0 : i32
    %c0_i32_0 = arith.constant 0 : i32
    %c0_i32_1 = arith.constant 0 : i32
    return %c0_i32, %c0_i32_0 : i32, i32
  }
  func.func @transform_4(%arg0: i32) -> (i32, i32) {
    %c0_i32 = arith.constant 0 : i32
    %c0_i32_0 = arith.constant 0 : i32
    %c0_i32_1 = arith.constant 0 : i32
    return %c0_i32, %c0_i32_0 : i32, i32
  }
  func.func @transform_5(%arg0: i32) -> (i32, i32) {
    %c0_i32 = arith.constant 0 : i32
    %c0_i32_0 = arith.constant 0 : i32
    return %c0_i32, %arg0 : i32, i32
  }
}

</mosaic_0001>

<bundles_post_ra>
// kernel: tpu_custom_call.1
= control target key start
LH: loop header
LB: loop body
LE: loop exit
PB: predicated region body
PF: predicated region fallthrough
CT: control target
= control target key end

     0   :  { %s1493_s0 = inlined_call_operand.hbm [shape: f32[16,256], index: 0, kind: input, shape index: {}]   ;;  %s1494_s1 = inlined_call_operand.vmem [shape: f32[32,16], index: 1, kind: input, shape index: {}]   ;;  %s1495_s2 = inlined_call_operand.hbm [shape: f32[32,128], index: 2, kind: input, shape index: {}]   ;;  %s1496_s3 = inlined_call_operand.hbm [shape: f32[128,384], index: 3, kind: input, shape index: {}]   ;;  %s1497_s4 = inlined_call_operand.vmem [shape: f32[16,384], index: 4, kind: input, shape index: {}]   ;;  %s1498_s5 = inlined_call_operand.hbm [shape: f32[16,256], index: 5, kind: output, shape index: {}]  }
   0x1   :  { %1506 = sst [smem:[#allocation13_spill]] %s1495_s2 }
   0x2   :  { %10 = vsyncpa [#allocation3], 0 }
   0x3   :  { %12 = vsyncpa [#allocation3 + $0x1], 0 }
   0x4   :  { %13 = vsyncpa [#allocation6], 0 }
   0x5   :  { %14 = vsyncpa [#allocation4], 0 }
   0x6   :  { %16 = vsyncpa [#allocation4 + $0x1], 0  ;;  %s1204_s18 = smov 0   ;;  %s1206_s19 = smov 0  }
   0x7   :  { %s1208_s20 = smov 0   ;;  %s1210_s21 = smov 0  }
   0x8 LB: > { %s1225_s22 = sadd.s32 4294967295, %s1159_s21   ;;  %s740_s23 = sadd.s32 4294967294, %s1159_s21   ;;  %s1159_s21 = sphi %s1210_s21, %s1532_s21   ;;  %s1155_s20 = sphi %s1208_s20, %s1531_s20   ;;  %s1151_s19 = sphi %s1206_s19, %s1530_s19   ;;  %s1147_s18 = sphi %s1204_s18, %s1529_s18  }
   0x9   : > { %s1229_s24 = sadd.s32 1, %s1159_s21   ;;  %s29_s25 = sadd.s32 1, %s1155_s20 }
   0xa   : > { %s26_s26 = ssub.s32 %s1159_s21, %s1229_s24  ;;  %p36_p0 = scmp.ne.s32.totalorder %s1155_s20, %s1151_s19 }
   0xb   : > { %p27_p1 = scmp.eq.s32.totalorder %s26_s26, 0  ;;  %p37_p2 = scmp.eq.s32.totalorder %s1159_s21, 0 }
   0xc   : > { %p42_p3 = scmp.ne.s32.totalorder %s1151_s19, %s1147_s18  ;;  %p1499_p4 = scmp.eq.s32.totalorder %s1225_s22, 0 }
   0xd   : > { %s1241_s27 = scalar_select %p27_p1, %s1155_s20, %s29_s25  }
   0xe   : > { %p1243_p5 = por %p37_p2, %p36_p0  ;;  %p1249_p6 = por %p1499_p4, %p42_p3 }
   0xf   : > { %1507 = sst [smem:[#allocation12_spill]] %s1241_s27  ;;  %p150_p7 = scmp.eq.s32.totalorder %s1225_s22, 1 }
  0x10   : > { %s1508_s28 = scalar_select %p1243_p5, 1, 0 }
  0x11   : > { %s1509_s29 = scalar_select %p1249_p6, 1, 0 }
  0x12   : > { %p156_p8 = scmp.eq.s32.totalorder %s740_s23, 1  ;;  %p741_p9 = scmp.ge.s32.totalorder %s1159_s21, 1 }
  0x13   : > { %p163_p10 = scmp.lt.s32.totalorder %s1159_s21, 3  ;;  %p1256_p11 = por %p150_p7, %p36_p0 }
  0x14   : > { %p1260_p12 = por %p156_p8, %p42_p3  ;;  %s1161_s8 = smov [#allocation5]  }
  0x15   : > { %s1510_s30 = scalar_select %p1256_p11, 1, 0 }
  0x16   : > { %s1511_s6 = scalar_select %p1260_p12, 1, 0 }
  0x17   : > { %p1264_p13 = pnand %p741_p9, %p163_p10  ;;  %s178_s9 = sshll.u32 %s1161_s8, 4  ;;  %s179_s9 = int_to_ptr.vmem [resolvable:$true] %s178_s9 }
  0x18   : > { %s1162_s11 = smov [#allocation7]   ;;  %s1514_s2 = sld [smem:[#allocation13_spill]] }
  0x19   : > { %s1512_s7 = scalar_select %p1264_p13, 1, 0 }
  0x1a   : > { %p915_p1 = pneg %p1264_p13  ;;  %s191_s12 = sshll.u32 %s1162_s11, 4  ;;  %s192_s12 = int_to_ptr.vmem [resolvable:$true] %s191_s12 }
  0x1c   : > { %p1272_p2 = pnand %p915_p1, %p1499_p4 }
  0x1e   : > { %s1003_s15 = scalar_lea.hbm %s1514_s2, 512  ;;  %p1005_p8 = pneg %p1272_p2 }
  0x1f   : > { %p1004_p7 = scmp.ne.s32.totalorder %s1514_s2, %s1003_s15  ;;  %p1010_p1 = scmp.lt.u32.totalorder %s1003_s15, %s1514_s2 }
  0x21   : > { %p1006_p9 = pnand %p1005_p8, %p1004_p7 }
  0x23   : > { %p1007_p10 = pneg %p1006_p9 }
  0x25   : > { %p1012_p0 = pnand %p1010_p1, %p1007_p10 }
  0x27   : > { %1015 = shalt.err (!%p1012_p0)
}
  0x28   : > { %s1016_s26 = scalar_lea.vmem %s179_s9, 512  ;;  %p1024_p11 = scmp.lt.s32.totalorder %s179_s9, %s179_s9 }
  0x29   : > { %p1017_p4 = scmp.ne.s32.totalorder %s179_s9, %s1016_s26  ;;  %p1025_p6 = scmp.lt.s32.totalorder %s1016_s26, %s1016_s26 }
  0x2b   : > { %p1019_p3 = pnand %p1017_p4, %p1005_p8  ;;  %p1026_p13 = por %p1025_p6, %p1024_p11 }
  0x2d   : > { %p1020_p12 = pneg %p1019_p3 }
  0x2f   : > { %p1027_p5 = pnand %p1026_p13, %p1020_p12 }
  0x31   : > { %1030 = shalt.err (!%p1027_p5)
}
  0x32   : > { %s1504_s8 = smov 128   ;;  %s1505_s11 = smov 8  }
  0x33   : > { %918 = dma.hbm_to_vmem [thread:$0]  (!%p1272_p2), %s1514_s2, 512, %s179_s9, [#allocation6], %s1504_s8, %s1504_s8, %s1505_s11  }
  0x34   : > { %p1515_p4 = scmp.ne.s32.totalorder %s1508_s28, 0  ;;  %p1516_p0 = scmp.lt.s32.totalorder %s1159_s21, 2 }
  0x35   : > { %s208_s16 = sand.u32 1, %s1155_s20   ;;  %s1031_s25 = scalar_lea.hbm %s1496_s3, 6144 }
  0x36   : > { %p1307_p6 = pnand %p1516_p0, %p1515_p4  ;;  %p1032_p5 = scmp.ne.s32.totalorder %s1496_s3, %s1031_s25 }
  0x37   : > { %p1038_p13 = scmp.lt.u32.totalorder %s1031_s25, %s1496_s3 }
  0x38   : > { %s1517_s15 = scalar_select %p1307_p6, 1, 0 }
  0x39   : > { %p1034_p11 = pnand %p1032_p5, %p1005_p8 }
  0x3b   : > { %p1035_p12 = pneg %p1034_p11 }
  0x3d   : > { %p1040_p3 = pnand %p1038_p13, %p1035_p12 }
  0x3f   : > { %1043 = shalt.err (!%p1040_p3)
}
  0x40   : > { %s1044_s13 = scalar_lea.vmem %s192_s12, 6144  ;;  %p1052_p1 = scmp.lt.s32.totalorder %s192_s12, %s192_s12 }
  0x41   : > { %p1045_p7 = scmp.ne.s32.totalorder %s192_s12, %s1044_s13  ;;  %p1053_p4 = scmp.lt.s32.totalorder %s1044_s13, %s1044_s13 }
  0x43   : > { %p1047_p9 = pnand %p1045_p7, %p1005_p8  ;;  %p1054_p0 = por %p1053_p4, %p1052_p1 }
  0x45   : > { %p1048_p10 = pneg %p1047_p9 }
  0x47   : > { %p1055_p6 = pnand %p1054_p0, %p1048_p10 }
  0x49   : > { %1058 = shalt.err (!%p1055_p6)
}
  0x4a   : > { %s1165_s27 = smov 384   ;;  %s1166_s14 = smov 24  }
  0x4b   : > { %921 = dma.hbm_to_vmem [thread:$0]  (!%p1272_p2), %s1496_s3, 6144, %s192_s12, [#allocation6], %s1165_s27, %s1165_s27, %s1166_s14  }
  0x4c   : > { %s745_s25 = sshll.u32 %s208_s16, 4  ;;  %s746_s26 = sshll.u32 %s1159_s21, 7 }
  0x4d   : > { %s1336_s13 = scalar_lea.hbm %s1493_s0, %s746_s26  ;;  %s212_s8 = scalar_lea.vmem [#allocation2], %s745_s25 }
  0x4e   : > { %s218_s11 = sshll.u32 %s212_s8, 4  ;;  %s1340_s10 = scalar_lea.sflag [#allocation3], %s208_s16  ;;  %s1338_s11 = int_to_ptr.vmem [resolvable:$true] %s218_s11 }
  0x4f   : > { %s1059_s2 = scalar_lea.hbm %s1336_s13, 256  ;;  %p1518_p2 = scmp.ne.s32.totalorder %s1517_s15, 0 }
  0x50   : > { %p1060_p8 = scmp.ne.s32.totalorder %s1336_s13, %s1059_s2  ;;  %s1064_s14 = scalar_lea.hbm %s1493_s0, 512 }
  0x51   : > { %p1061_p6 = pneg %p1518_p2  ;;  %p1065_p12 = scmp.lt.u32.totalorder %s1336_s13, %s1493_s0 }
  0x52   : > { %p1066_p13 = scmp.lt.u32.totalorder %s1064_s14, %s1059_s2  ;;  %p1068_p7 = scmp.lt.u32.totalorder %s1059_s2, %s1336_s13 }
  0x53   : > { %p1062_p5 = pnand %p1061_p6, %p1060_p8 }
  0x54   : > { %p1067_p3 = por %p1066_p13, %p1065_p12 }
  0x55   : > { %p1063_p11 = pneg %p1062_p5 }
  0x56   : > { %p1069_p9 = por %p1068_p7, %p1067_p3 }
  0x58   : > { %p1070_p10 = pnand %p1069_p9, %p1063_p11 }
  0x5a   : > { %1073 = shalt.err (!%p1070_p10)
}
  0x5b   : > { %s1074_s8 = scalar_lea.vmem %s1338_s11, 256  ;;  %s1167_s16 = smov [#allocation2]  }
  0x5c   : > { %p1075_p1 = scmp.ne.s32.totalorder %s1338_s11, %s1074_s8  ;;  %s1079_s25 = sshll.u32 %s1167_s16, 4  ;;  %s1080_s25 = int_to_ptr.vmem [resolvable:$false] %s1079_s25 }
  0x5d   : > { %s1081_s26 = scalar_lea.vmem %s1080_s25, 512  ;;  %p1082_p8 = scmp.lt.s32.totalorder %s1338_s11, %s1080_s25 }
  0x5e   : > { %p1077_p4 = pnand %p1075_p1, %p1061_p6  ;;  %p1083_p5 = scmp.lt.s32.totalorder %s1081_s26, %s1074_s8 }
  0x60   : > { %p1078_p0 = pneg %p1077_p4  ;;  %p1084_p12 = por %p1083_p5, %p1082_p8 }
  0x62   : > { %p1085_p13 = pnand %p1084_p12, %p1078_p0 }
  0x64   : > { %1088 = shalt.err (!%p1085_p13)
}
  0x65   : > { %s1168_s2 = smov 256   ;;  %s1519_s28 = smov 8  }
  0x66   : > { %s1520_s9 = smov 128   ;;  %p1521_p6 = scmp.ne.s32.totalorder %s1512_s7, 0 }
  0x67   : > { %925 = dma.hbm_to_vmem [thread:$0]  (!%p1518_p2), %s1336_s13, 256, %s1338_s11, %s1340_s10, %s1168_s2, %s1520_s9, %s1519_s28  }
  0x68   : > { %230 = sbr.rel (%p1521_p6) target bundleno = 421 (0x1a5), region = 40  ;;  %s1373_s12 = sand.u32 (!%p1521_p6), 1, %s1151_s19  }
  0x69   : > { %s748_s27 = sshll.u32 (!%p1521_p6), %s1373_s12, 4  ;;  %s233_s14 = scalar_lea.sflag (!%p1521_p6), [#allocation3], %s1373_s12 }
  0x6a   : > { %s236_s15 = scalar_lea.vmem (!%p1521_p6), [#allocation2], %s748_s27  ;;  %p1522_p11 = scmp.ne.s32.totalorder (!%p1521_p6), %s1509_s29, 0 }
  0x6f   : > { %1134 = dma.done.wait (%p1522_p11), %s233_s14, 256  }
  0x70   : > { %1136 = vsyncadd (%p1522_p11), %s233_s14, 4294967040  ;;  %p1523_p2 = scmp.eq.s32.totalorder %s1225_s22, 0 }
  0x72   : > { %1138 = dma.done.wait (%p1523_p2), [#allocation6], 6656   ;;  %p1524_p3 = pmov %p1523_p2 }
  0x73   : > { %v1169_v0 = vmov 0.0   ;;  %v1388_v1 = vld [vmem:[%s236_s15] sm:$0xff]  ;;  %v1390_v2 = vld [vmem:[%s236_s15 + $0x8] sm:$0xff]  ;;  %vm281_vm0 = vcmask 130048   ;;  %s763_s10 = sshll.u32 %s1225_s22, 7  ;;  %s270_s17 = scalar_lea.vmem [#allocation8], %s748_s27 }
  0x74   : > { %1140 = vsyncadd (%p1524_p3), [#allocation6], 4294960640  ;;  %497 = vmatprep.mubr.f32.mxu1 %v1169_v0  ;;  %v380_v3 = vld [vmem:[#allocation7 + $0x8] sm:$0xff]  ;;  %v835_v4 = vpack.c.bf16 %v1390_v2, %v1388_v1  ;;  %v383_v5 = vld [vmem:[#allocation7 + $0x20] sm:$0xff]  ;;  %s648_s23 = sshll.u32 %s270_s17, 4  ;;  %s1447_s25 = scalar_lea.hbm %s1498_s5, %s763_s10  ;;  %s1449_s23 = int_to_ptr.vmem [resolvable:$true] %s648_s23 }
  0x75   : > { %v379_v6 = vld [vmem:[#allocation7] sm:$0xff]  ;;  %v382_v7 = vld [vmem:[#allocation7 + $0x18] sm:$0xff]  ;;  %v839_v8 = vpack.c.bf16 %v383_v5, %v380_v3  ;;  %v389_v12 = vld [vmem:[#allocation7 + $0x50] sm:$0xff]  ;;  %s636_s22 = scalar_lea.sflag [#allocation4], %s1373_s12  ;;  %s1089_s26 = scalar_lea.vmem %s1449_s23, 256 }
  0x76   : > { %v841_v9 = vpack.c.bf16 %v382_v7, %v379_v6  ;;  %v273_v10 = vld [vmem:[%s1494_s1] sm:$0xff]  ;;  %v386_v11 = vld [vmem:[#allocation7 + $0x38] sm:$0xff]  ;;  %836 = vmatprep.subr.bf16.mxu0 %v835_v4  ;;  %v381_v14 = vld [vmem:[#allocation7 + $0x10] sm:$0xff]  ;;  %p1090_p7 = scmp.ne.s32.totalorder %s1449_s23, %s1089_s26  ;;  %p1525_p9 = scmp.ne.s32.totalorder %s1510_s30, 0 }
  0x77   : > { %794 = vmatprep.mubr.msk.f32.mxu0 %vm281_vm0, %v273_v10  ;;  %v843_v13 = vpack.c.bf16 %v389_v12, %v386_v11  ;;  %v384_v15 = vld [vmem:[#allocation7 + $0x28] sm:$0xff]  ;;  %840 = vmatprep.subr.bf16.mxu1 %v839_v8  ;;  %v385_v18 = vld [vmem:[#allocation7 + $0x30] sm:$0xff]  ;;  %v395_v22 = vld [vmem:[#allocation7 + $0x80] sm:$0xff]  ;;  %s1170_s27 = smov [#allocation8]  }
  0x78   : > { %v274_v16 = vld [vmem:[%s1494_s1 + $0x8] sm:$0xff]  ;;  %838 = vmatpush3.bf16.msra.mxu0 %v835_v4  ;;  %v871_v17 = vpack.c.bf16 %v384_v15, %v381_v14  ;;  %842 = vmatpush1.bf16.msra.mxu1 %v841_v9  ;;  %v387_v23 = vld [vmem:[#allocation7 + $0x40] sm:$0xff]  ;;  %v390_v24 = vld [vmem:[#allocation7 + $0x58] sm:$0xff]  ;;  %p1091_p10 = pnand %p1090_p7, %p1525_p9  ;;  %s1093_s2 = sshll.u32 %s1170_s27, 4  ;;  %s1094_s2 = int_to_ptr.vmem [resolvable:$false] %s1093_s2 }
  0x79   : > { %v388_v19 = vld [vmem:[#allocation7 + $0x48] sm:$0xff]  ;;  %844 = vmatprep.subr.bf16.mxu1 %v843_v13  ;;  %v875_v26 = vpack.c.bf16 %v390_v24, %v387_v23  ;;  %v391_v27 = vld [vmem:[#allocation7 + $0x60] sm:$0xff]  ;;  %v394_v28 = vld [vmem:[#allocation7 + $0x78] sm:$0xff]  ;;  %s1095_s28 = scalar_lea.vmem %s1094_s2, 512  ;;  %p1096_p4 = scmp.lt.s32.totalorder %s1449_s23, %s1094_s2 }
  0x7a   : > { %v392_v20 = vld [vmem:[#allocation7 + $0x68] sm:$0xff]  ;;  %v845_v21 = vpack.c.bf16 %v388_v19, %v385_v18  ;;  %872 = vmatprep.subr.bf16.mxu0 %v871_v17  ;;  %v398_v29 = vld [vmem:[#allocation7 + $0x98] sm:$0xff]  ;;  %v401_v30 = vld [vmem:[#allocation7 + $0xb0] sm:$0xff]  ;;  %v849_v33 = vpack.c.bf16 %v394_v28, %v391_v27  ;;  %p1092_p1 = pneg %p1091_p10  ;;  %p1097_p0 = scmp.lt.s32.totalorder %s1095_s28, %s1089_s26 }
  0x7b   : > { %v847_v25 = vpack.c.bf16 %v395_v22, %v392_v20  ;;  %795 = vmatmul.mubr.msk.f32.vlgmr.msra.gmra.mrb[0].mxu0 %vm281_vm0, %v274_v16  ;;  %v393_v31 = vld [vmem:[#allocation7 + $0x70] sm:$0xff]  ;;  %v396_v32 = vld [vmem:[#allocation7 + $0x88] sm:$0xff]  ;;  %v851_v36 = vpack.c.bf16 %v401_v30, %v398_v29  ;;  %v399_v38 = vld [vmem:[#allocation7 + $0xa0] sm:$0xff] }
  0x7c   : > { %874 = vmatpush3.bf16.msra.mxu0 %v871_v17  ;;  %846 = vmatpush1.bf16.msra.mxu1 %v845_v21  ;;  %v879_v34 = vpack.c.bf16 %v396_v32, %v393_v31  ;;  %v397_v35 = vld [vmem:[#allocation7 + $0x90] sm:$0xff]  ;;  %v400_v37 = vld [vmem:[#allocation7 + $0xa8] sm:$0xff]  ;;  %v402_v39 = vld [vmem:[#allocation7 + $0xb8] sm:$0xff]  ;;  %p1098_p8 = por %p1097_p0, %p1096_p4 }
  0x7d   : > { %876 = vmatprep.subr.bf16.mxu0 %v875_v26  ;;  %848 = vmatprep.subr.bf16.mxu1 %v847_v25  ;;  %v404_v40 = vld [vmem:[#allocation7 + $0xc8] sm:$0xff]  ;;  %v407_v41 = vld [vmem:[#allocation7 + $0xe0] sm:$0xff]  ;;  %v853_v42 = vpack.c.bf16 %v400_v37, %v397_v35  ;;  %v883_v43 = vpack.c.bf16 %v402_v39, %v399_v38  ;;  %v406_v46 = vld [vmem:[#allocation7 + $0xd8] sm:$0xff] }
  0x7e   : > { %v403_v44 = vld [vmem:[#allocation7 + $0xc0] sm:$0xff]  ;;  %v855_v45 = vpack.c.bf16 %v407_v41, %v404_v40  ;;  %v405_v47 = vld [vmem:[#allocation7 + $0xd0] sm:$0xff]  ;;  %v408_v48 = vld [vmem:[#allocation7 + $0xe8] sm:$0xff]  ;;  %p1099_p5 = pnand %p1098_p8, %p1092_p1 }
  0x7f   : > { %v410_v49 = vld [vmem:[#allocation7 + $0xf8] sm:$0xff]  ;;  %v413_v50 = vld [vmem:[#allocation7 + $0x110] sm:$0xff]  ;;  %v857_v52 = vpack.c.bf16 %v406_v46, %v403_v44  ;;  %v887_v53 = vpack.c.bf16 %v408_v48, %v405_v47  ;;  %v412_v57 = vld [vmem:[#allocation7 + $0x108] sm:$0xff] }
  0x80   : > { %878 = vmatpush3.bf16.msra.mxu0 %v875_v26  ;;  %850 = vmatpush1.bf16.msra.mxu1 %v849_v33  ;;  %v275_v51 = vld [vmem:[%s1494_s1 + $0x10] sm:$0xff]  ;;  %v276_v55 = vld [vmem:[%s1494_s1 + $0x18] sm:$0xff]  ;;  %v859_v56 = vpack.c.bf16 %v413_v50, %v410_v49  ;;  %v411_v58 = vld [vmem:[#allocation7 + $0x100] sm:$0xff] }
  0x81   : > { %880 = vmatprep.subr.bf16.mxu0 %v879_v34  ;;  %852 = vmatprep.subr.bf16.mxu1 %v851_v36  ;;  %v409_v54 = vld [vmem:[#allocation7 + $0xf0] sm:$0xff]  ;;  %v414_v59 = vld [vmem:[#allocation7 + $0x118] sm:$0xff]  ;;  %v416_v60 = vld [vmem:[#allocation7 + $0x128] sm:$0xff] }
  0x82   : > { %797 = vmatprep.mubr.msk.f32.mxu0 %vm281_vm0, %v275_v51  ;;  %v419_v61 = vld [vmem:[#allocation7 + $0x140] sm:$0xff]  ;;  %v861_v62 = vpack.c.bf16 %v412_v57, %v409_v54  ;;  %v891_v63 = vpack.c.bf16 %v414_v59, %v411_v58  ;;  %v418_v5 = vld [vmem:[#allocation7 + $0x138] sm:$0xff]  ;;  %v417_v6 = vld [vmem:[#allocation7 + $0x130] sm:$0xff] }
  0x83   : > { %798 = vmatmul.mubr.msk.f32.gmra.mrb[2].mxu0 %vm281_vm0, %v276_v55  ;;  %v415_v3 = vld [vmem:[#allocation7 + $0x120] sm:$0xff]  ;;  %v863_v4 = vpack.c.bf16 %v419_v61, %v416_v60  ;;  %v420_v7 = vld [vmem:[#allocation7 + $0x148] sm:$0xff]  ;;  %v422_v8 = vld [vmem:[#allocation7 + $0x158] sm:$0xff] }
  0x84   : > { %882 = vmatpush3.bf16.msra.mxu0 %v879_v34  ;;  %854 = vmatpush1.bf16.msra.mxu1 %v853_v42  ;;  %v425_v9 = vld [vmem:[#allocation7 + $0x170] sm:$0xff]  ;;  %v865_v10 = vpack.c.bf16 %v418_v5, %v415_v3  ;;  %v895_v11 = vpack.c.bf16 %v420_v7, %v417_v6  ;;  %v424_v14 = vld [vmem:[#allocation7 + $0x168] sm:$0xff]  ;;  %v423_v15 = vld [vmem:[#allocation7 + $0x160] sm:$0xff] }
  0x85   : > { %884 = vmatprep.subr.bf16.mxu0 %v883_v43  ;;  %856 = vmatprep.subr.bf16.mxu1 %v855_v45  ;;  %v421_v12 = vld [vmem:[#allocation7 + $0x150] sm:$0xff]  ;;  %v867_v13 = vpack.c.bf16 %v425_v9, %v422_v8  ;;  %v426_v16 = vld [vmem:[#allocation7 + $0x178] sm:$0xff]  ;;  %v427_v23 = vld [vmem:[%s1497_s4] sm:$0xff] }
  0x86   : > { %832 = vmatprep.mubr.f32.mxu0 %v1388_v1  ;;  %v869_v17 = vpack.c.bf16 %v424_v14, %v421_v12  ;;  %v899_v18 = vpack.c.bf16 %v426_v16, %v423_v15  ;;  %v428_v24 = vld [vmem:[%s1497_s4 + $0x8] sm:$0xff]  ;;  %v430_v29 = vld [vmem:[%s1497_s4 + $0x18] sm:$0xff]  ;;  %v429_v30 = vld [vmem:[%s1497_s4 + $0x10] sm:$0xff] }
  0x87   : > { %v432_v27 = vld [vmem:[%s1497_s4 + $0x28] sm:$0xff]  ;;  %v431_v33 = vld [vmem:[%s1497_s4 + $0x20] sm:$0xff]  ;;  %v279_v59 = vld [vmem:[#allocation5 + $0x10] sm:$0xff] }
  0x88   : > { %886 = vmatpush3.bf16.msra.mxu0 %v883_v43  ;;  %858 = vmatpush1.bf16.msra.mxu1 %v857_v52  ;;  %v277_v58 = vld [vmem:[#allocation5] sm:$0xff] }
  0x89   : > { %888 = vmatprep.subr.bf16.mxu0 %v887_v53  ;;  %860 = vmatprep.subr.bf16.mxu1 %v859_v56 }
  0x8c   : > { %890 = vmatpush3.bf16.msra.mxu0 %v887_v53  ;;  %862 = vmatpush1.bf16.msra.mxu1 %v861_v62  ;;  %v278_v62 = vld [vmem:[#allocation5 + $0x8] sm:$0xff] }
  0x8d   : > { %892 = vmatprep.subr.bf16.mxu0 %v891_v63  ;;  %864 = vmatprep.subr.bf16.mxu1 %v863_v4  ;;  %v280_v4 = vld [vmem:[#allocation5 + $0x18] sm:$0xff] }
  0x90   : > { %894 = vmatpush3.bf16.msra.mxu0 %v891_v63  ;;  %866 = vmatpush1.bf16.msra.mxu1 %v865_v10 }
  0x91   : > { %896 = vmatprep.subr.bf16.mxu0 %v895_v11  ;;  %868 = vmatprep.subr.bf16.mxu1 %v867_v13 }
  0x94   : > { %898 = vmatpush3.bf16.msra.mxu0 %v895_v11  ;;  %870 = vmatpush1.bf16.msra.mxu1 %v869_v17 }
  0x95   : > { %900 = vmatprep.subr.bf16.mxu0 %v899_v18 }
  0x97   : > { %498 = vmatmul.mubr.f32.vlgmr.msra.gmra.mrb[0].mxu1 %v1388_v1 }
  0x98   : > { %902 = vmatpush3.bf16.msra.mxu0 %v899_v18  ;;  %503 = vmatprep.mubr.f32.mxu1 %v1169_v0 }
  0x9b   : > { %833 = vmatmul.mubr.f32.vlgmr.msra.gmra.mrb[4].mxu0 %v1390_v2  ;;  %504 = vmatmul.mubr.f32.gmra.mrb[2].mxu1 %v1390_v2 }
 0x14e   : > { %v1415_v19 = vpop.f32.mrb[0].mxu0 }
 0x14f   : > { %v360_v20 = vpop.f32.mrb[1].mxu0  ;;  %v366_v8 = vadd.f32 %v1415_v19, %v278_v62 }
 0x150   : > { %v361_v60 = vadd.f32 %v360_v20, %v277_v58 }
 0x156   : > { %v1417_v21 = vpop.f32.mrb[2].mxu0 }
 0x157   : > { %v370_v22 = vpop.f32.mrb[3].mxu0  ;;  %v376_v10 = vadd.f32 %v1417_v21, %v280_v4 }
 0x158   : > { %v371_v63 = vadd.f32 %v370_v22, %v279_v59 }
 0x16a   : > { %v499_v25 = vpop.f32.mrb[0].mxu1 }
 0x16b   : > { %v500_v0 = vadd.f32 %v499_v25, %v427_v23  ;;  %v501_v26 = vpop.f32.mrb[1].mxu1 }
 0x16c   : > { %v502_v28 = vadd.f32 %v501_v26, %v428_v24 }
 0x16d   : > { %v756_v31 = vmul.f32 -1.442695, %v500_v0 }
 0x16e   : > { %v834_v32 = vpop.f32.mrb[4].mxu0  ;;  %v757_v34 = vmul.f32 -1.442695, %v502_v28  ;;  %v505_v35 = vpop.f32.mrb[2].mxu1 }
 0x16f   : > { %v582_v36 = vadd.f32 %v834_v32, %v432_v27  ;;  %v576_v37 = vpop.f32.mrb[5].mxu0  ;;  %979 = vpow2.f32 %v756_v31  ;;  %v506_v38 = vadd.f32 %v505_v35, %v430_v29  ;;  %v507_v39 = vpop.f32.mrb[3].mxu1 }
 0x170   : > { %v577_v40 = vadd.f32 %v576_v37, %v429_v30  ;;  %981 = vpow2.f32 %v757_v34  ;;  %v508_v42 = vadd.f32 %v507_v39, %v431_v33 }
 0x171   : > { %v761_v41 = vmul.f32 -1.442695, %v582_v36  ;;  %v759_v43 = vmul.f32 -1.442695, %v506_v38 }
 0x172   : > { %v758_v44 = vmul.f32 -1.442695, %v577_v40  ;;  %v760_v45 = vmul.f32 -1.442695, %v508_v42 }
 0x173   : > { %983 = vpow2.f32 %v761_v41 }
 0x174   : > { %985 = vpow2.f32 %v759_v43 }
 0x175   : > { %987 = vpow2.f32 %v760_v45 }
 0x176   : > { %989 = vpow2.f32 %v758_v44 }
 0x179   : > { %v980_v46 = vpop.eup %979 }
 0x17a   : > { %v982_v47 = vpop.eup %981  ;;  %v603_v48 = vadd.f32 1.0, %v980_v46 }
 0x17b   : > { %v604_v49 = vadd.f32 1.0, %v982_v47 }
 0x17c   : > { %991 = vrcp.f32 %v603_v48 }
 0x17d   : > { %v984_v50 = vpop.eup %983  ;;  %993 = vrcp.f32 %v604_v49 }
 0x17e   : > { %v986_v51 = vpop.eup %985  ;;  %v608_v52 = vadd.f32 1.0, %v984_v50 }
 0x17f   : > { %v988_v53 = vpop.eup %987  ;;  %v606_v54 = vadd.f32 1.0, %v986_v51 }
 0x180   : > { %v990_v55 = vpop.eup %989  ;;  %995 = vrcp.f32 %v608_v52  ;;  %v607_v56 = vadd.f32 1.0, %v988_v53 }
 0x181   : > { %997 = vrcp.f32 %v606_v54  ;;  %v605_v57 = vadd.f32 1.0, %v990_v55 }
 0x182   : > { %999 = vrcp.f32 %v607_v56 }
 0x183   : > { %1001 = vrcp.f32 %v605_v57 }
 0x186   : > { %v992_v61 = vpop.eup %991 }
 0x187   : > { %v994_v3 = vpop.eup %993  ;;  %v621_v5 = vmul.f32 %v992_v61, %v361_v60 }
 0x188   : > { %v623_v6 = vmul.f32 %v994_v3, %v371_v63 }
 0x18a   : > { %v996_v7 = vpop.eup %995  ;;  %v625_v11 = vadd.f32 %v623_v6, %v621_v5 }
 0x18b   : > { %v998_v9 = vpop.eup %997  ;;  %v628_v15 = vmul.f32 %v996_v7, %v1390_v2 }
 0x18c   : > { %v1000_v12 = vpop.eup %999  ;;  %v622_v13 = vmul.f32 %v998_v9, %v366_v8 }
 0x18d   : > { %v1002_v14 = vpop.eup %1001  ;;  %v624_v16 = vmul.f32 %v1000_v12, %v376_v10 }
 0x18e   : > { %v627_v17 = vmul.f32 %v1002_v14, %v1388_v1 }
 0x18f   : > { %v626_v18 = vadd.f32 %v624_v16, %v622_v13 }
 0x190   : > { %v629_v19 = vadd.f32 %v627_v17, %v625_v11 }
 0x191   : > { %v630_v20 = vadd.f32 %v628_v15, %v626_v18 }
 0x192   : > { %v631_v21 = vmax.f32 %v629_v19, 0.0 }
 0x193   : > { %v632_v1 = vmax.f32 %v630_v20, 0.0 }
 0x194   : > { %633 = vst [vmem:[%s270_s17] sm:$0xff] %v631_v21 }
 0x195   : > { %634 = vst [vmem:[%s270_s17 + $0x8] sm:$0xff] %v632_v1 }
 0x196   : > { %1102 = shalt.err (!%p1099_p5)
}
 0x197   : > { %s1103_s9 = scalar_lea.hbm %s1447_s25, 256  ;;  %s1107_s29 = scalar_lea.hbm %s1498_s5, 512 }
 0x198   : > { %p1104_p12 = scmp.ne.s32.totalorder %s1447_s25, %s1103_s9  ;;  %p1108_p11 = scmp.lt.u32.totalorder %s1447_s25, %s1498_s5 }
 0x199   : > { %p1109_p2 = scmp.lt.u32.totalorder %s1107_s29, %s1103_s9  ;;  %p1111_p7 = scmp.lt.u32.totalorder %s1103_s9, %s1447_s25 }
 0x19a   : > { %p1105_p13 = pnand %p1104_p12, %p1525_p9 }
 0x19b   : > { %p1110_p3 = por %p1109_p2, %p1108_p11 }
 0x19c   : > { %p1106_p6 = pneg %p1105_p13 }
 0x19d   : > { %p1112_p10 = por %p1111_p7, %p1110_p3 }
 0x19f   : > { %p1113_p1 = pnand %p1112_p10, %p1106_p6 }
 0x1a1   : > { %1116 = shalt.err (!%p1113_p1)
}
 0x1a2   : > { %s1171_s13 = smov 128   ;;  %s1172_s10 = smov 256  }
 0x1a3   : > { %s1173_s17 = smov 8  }
 0x1a4   : > { %913 = dma.vmem_to_hbm [thread:$0]  (%p1525_p9), %s1449_s23, 256, %s1447_s25, %s636_s22, %s1171_s13, %s1172_s10, %s1173_s17  }
 0x1a5 PF: > { %s663_s8 = sand.u32 1, %s1147_s18   ;;  %p1526_p4 = scmp.ne.s32.totalorder %s1511_s6, 0 }
 0x1a6   : > { %p1527_p0 = scmp.ge.s32.totalorder %s1159_s21, 2  ;;  %s664_s16 = scalar_lea.sflag [#allocation4], %s663_s8 }
 0x1a8   : > { %p927_p8 = pnand %p1527_p0, %p1526_p4 }
 0x1aa   : > { %1142 = dma.done.wait (!%p927_p8), %s664_s16, 256  }
 0x1ab   : > { %1144 = vsyncadd (!%p927_p8), %s664_s16, 4294967040  ;;  %s1528_s26 = sld [smem:[#allocation12_spill]]  ;;  %p19_p5 = scmp.ge.s32.totalorder %s1229_s24, 4  }
 0x1ac   : > { %s1529_s18 = smov %s1151_s19  ;;  %s1530_s19 = smov %s1155_s20 }
 0x1ad   : > { %s1532_s21 = smov %s1229_s24  ;;  %21 = sbr.rel (!%p19_p5) target bundleno = 8 (0x8), region = 93 }
 0x1b1   : > { %s1531_s20 = smov %s1528_s26 }
 0x1b4   :  { %669 = vsyncpa [#allocation3], 1 }
 0x1b5   :  { %671 = vsyncpa [#allocation3 + $0x1], 1 }
 0x1b6   :  { %672 = vsyncpa [#allocation6], 1 }
 0x1b7   :  { %673 = vsyncpa [#allocation4], 1 }
 0x1b8   :  { %675 = vsyncpa [#allocation4 + $0x1], 1 }

</bundles_post_ra>
